<compile_context>
chip_gen: v5e
topology: v5e:2x2
jax: 0.10.0
libtpu: 0.0.40
codegen_flags: <defaults>
</compile_context>

<pallas_src>
import functools
import math

import jax
import jax.numpy as jnp
from jax import lax
from jax.experimental import pallas as pl
from jax.experimental.pallas import tpu as pltpu

_LANE = 128
_SUBLANE = 8
_MIB = 1024 * 1024
_INV_SQRT2 = 1.0 / math.sqrt(2.0)


def _round_up(n, m):
    return ((n + m - 1) // m) * m


def _cdiv(a, b):
    return (a + b - 1) // b


@functools.lru_cache(maxsize=None)
def _vmem_capacity_bytes():
    """Physical per-core VMEM (128 MiB on v5e/v6e, 64 MiB on v7x)."""
    try:
        info = pltpu.get_tpu_info()
        cap = getattr(info, "vmem_capacity_bytes", None)
        if cap:
            return int(cap)
    except Exception:
        pass
    return 64 * _MIB  # conservative fallback (v7x-sized VMEM)


def _vmem_budget_and_cap(vmem_budget_mib):
    phys = _vmem_capacity_bytes()
    # Hard ceiling handed to the compiler: strictly below physical VMEM with
    # headroom for Mosaic-internal scratch (the old 96 MiB clamp was illegal
    # on v7x's 64 MiB parts).
    cap = min(phys - 8 * _MIB, 100 * _MIB)
    if vmem_budget_mib is not None:
        budget = int(vmem_budget_mib) * _MIB
    else:
        # ~96 MiB on 128 MiB parts (v5e/v6e), ~44 MiB on 64 MiB parts (v7x).
        budget = min(int(phys * 0.75), phys - 20 * _MIB)
    return min(budget, cap), cap


def _select_tiles(M8, dim_p, hidden_128, itemsize, budget):
    """Pick (tile_m, tile_h, hidden_p, single_hidden_tile).

    tile_m is a multiple of 8 (<= 512); tile_h is a multiple of 128 (256 when
    possible); hidden_p = n_h * tile_h >= hidden_128 with minimal padding.
    """
    token_tiles = (512, 256, 128, 64, 32, 16, 8)

    def fixed_bytes(tm):
        # double-buffered x tile + out tile, plus the (tiny) b2 block.
        return 4 * tm * dim_p * itemsize + 2 * dim_p * 4

    def per_col_bytes(tm):
        # per hidden column: W1 column + W2 row + b1 element (double-buffered)
        # plus the f32 GELU intermediate and its cast-to-compute-dtype copy.
        return 2 * (2 * dim_p * itemsize + 4) + tm * (4 + itemsize)

    # 1) Weights-resident path: whole (padded) W1/W2/b1 as one hidden tile, so
    #    their block index is constant and the weights are DMA'd exactly once
    #    for the whole grid.  Only take it with a reasonably large token tile.
    for cand in token_tiles:
        tm = min(cand, M8)
        if tm < 128 and M8 >= 128:
            break
        if fixed_bytes(tm) + hidden_128 * per_col_bytes(tm) <= budget:
            return tm, hidden_128, hidden_128, True

    # 2) Hidden-tiled reduction: largest token tile that still allows a hidden
    #    tile of >= 256 columns (full MXU K/N on v6e/v7x).
    chosen = None
    fallback = None
    for cand in token_tiles:
        tm = min(cand, M8)
        avail = budget - fixed_bytes(tm) - tm * dim_p * 4  # + f32 accumulator
        cols = max(avail // per_col_bytes(tm), 0)
        if fallback is None or cols > fallback[1]:
            fallback = (tm, cols)
        if cols >= 256:
            chosen = (tm, cols)
            break
    if chosen is None:
        chosen = fallback
    tile_m, max_cols = chosen

    if max_cols >= hidden_128:
        return tile_m, hidden_128, hidden_128, True

    max_tile = max((max_cols // _LANE) * _LANE, _LANE)
    upper = min(max_tile, _round_up(hidden_128, _LANE))
    best_key, best_th, best_nh = None, None, None
    for th in range(upper, _LANE - 1, -_LANE):
        n_h = _cdiv(hidden_128, th)
        # Prefer: least padded hidden, then 256-multiple tiles, then fewer steps.
        key = (n_h * th, 0 if th % 256 == 0 else 1, n_h)
        if best_key is None or key < best_key:
            best_key, best_th, best_nh = key, th, n_h
    tile_h, n_h = best_th, best_nh
    return tile_m, tile_h, n_h * tile_h, n_h == 1


def _gelu_exact(h):
    # Exact (erf-based) GELU — matches torch.nn.GELU() default.
    return 0.5 * h * (1.0 + lax.erf(h * _INV_SQRT2))


def _ffn_kernel_fused(x_ref, w1_ref, b1_ref, w2_ref, b2_ref, o_ref):
    """Single hidden tile: Linear -> GELU -> Linear fused, no scratch / RMW."""
    h = jnp.dot(x_ref[...], w1_ref[...], preferred_element_type=jnp.float32)
    h = _gelu_exact(h + b1_ref[...].astype(jnp.float32))
    # Dropout(p=0.0) is the identity.
    out = jnp.dot(h.astype(w2_ref.dtype), w2_ref[...],
                  preferred_element_type=jnp.float32)
    o_ref[...] = (out + b2_ref[...].astype(jnp.float32)).astype(o_ref.dtype)


def _ffn_kernel_acc(x_ref, w1_ref, b1_ref, w2_ref, b2_ref, o_ref, acc_ref):
    """Hidden dim tiled on grid axis 1; second matmul accumulated in f32 VMEM."""
    j = pl.program_id(1)

    @pl.when(j == 0)
    def _():
        acc_ref[...] = jnp.zeros_like(acc_ref)

    h = jnp.dot(x_ref[...], w1_ref[...], preferred_element_type=jnp.float32)
    h = _gelu_exact(h + b1_ref[...].astype(jnp.float32))
    # Dropout(p=0.0) is the identity.
    acc_ref[...] += jnp.dot(h.astype(w2_ref.dtype), w2_ref[...],
                            preferred_element_type=jnp.float32)

    @pl.when(j == pl.num_programs(1) - 1)
    def _():
        o_ref[...] = (acc_ref[...] + b2_ref[...].astype(jnp.float32)
                      ).astype(o_ref.dtype)


@functools.partial(jax.jit, static_argnames=("compute_dtype", "vmem_budget_mib"))
def feed_forward(x, w1, b1, w2, b2, *, compute_dtype=None, vmem_budget_mib=None):
    """x: (B, S, dim); w1: (dim, hidden); b1: (1, hidden); w2: (hidden, dim); b2: (1, dim).

    compute_dtype: optional MXU dtype for x/W1/W2 (e.g. jnp.bfloat16);
    accumulation stays f32.  Default None keeps exact x.dtype (torch parity).
    """
    B, S, dim = x.shape
    hidden = w1.shape[1]
    M = B * S
    out_dtype = x.dtype
    cdt = jnp.dtype(compute_dtype) if compute_dtype is not None else jnp.dtype(x.dtype)
    itemsize = cdt.itemsize
    out_itemsize = jnp.dtype(out_dtype).itemsize

    dim_p = _round_up(dim, _LANE)
    hidden_128 = _round_up(hidden, _LANE)
    M8 = _round_up(M, _SUBLANE)

    budget, vmem_cap = _vmem_budget_and_cap(vmem_budget_mib)
    tile_m, tile_h, hidden_p, single = _select_tiles(
        M8, dim_p, hidden_128, itemsize, budget)
    M_p = _round_up(M8, tile_m)
    n_m = M_p // tile_m
    n_h = hidden_p // tile_h

    # Pad rows/features to the chosen tile multiples (lane-dense stores; zero
    # padding is exact: b1=0 -> gelu(0)=0 -> zero W2 rows contribute nothing)
    # and cast to the compute dtype.  Pads are emitted only when actually
    # needed, so already-aligned production shapes pay no per-call weight copy.
    x2d = x.reshape(M, dim).astype(cdt)
    if (M_p, dim_p) != (M, dim):
        x2d = jnp.pad(x2d, ((0, M_p - M), (0, dim_p - dim)))
    w1_p = w1.astype(cdt)
    if (dim_p, hidden_p) != (dim, hidden):
        w1_p = jnp.pad(w1_p, ((0, dim_p - dim), (0, hidden_p - hidden)))
    w2_p = w2.astype(cdt)
    if (hidden_p, dim_p) != (hidden, dim):
        w2_p = jnp.pad(w2_p, ((0, hidden_p - hidden), (0, dim_p - dim)))
    b1_p = jnp.pad(b1, ((0, 0), (0, hidden_p - hidden))) if hidden_p != hidden else b1
    b2_p = jnp.pad(b2, ((0, 0), (0, dim_p - dim))) if dim_p != dim else b2

    # Scoped-VMEM limit sized from the chosen tiles, capped below physical VMEM.
    step_bytes = 2 * (tile_m * dim_p * itemsize                       # x tile
                      + dim_p * tile_h * itemsize                     # W1 tile
                      + tile_h * jnp.dtype(b1.dtype).itemsize         # b1 tile
                      + tile_h * dim_p * itemsize                     # W2 tile
                      + dim_p * jnp.dtype(b2.dtype).itemsize          # b2
                      + tile_m * dim_p * out_itemsize)                # out tile
    step_bytes += tile_m * tile_h * (4 + itemsize)       # f32 GELU h + cast copy
    if not single:
        step_bytes += tile_m * dim_p * 4                 # f32 accumulator
    vmem_limit = int(min(max(step_bytes * 1.3, 32 * _MIB), vmem_cap))

    weight_bytes = ((dim_p * hidden_p + hidden_p * dim_p) * itemsize
                    + (hidden_p + dim_p) * 4)
    weight_reps = 1 if single else n_m        # weights re-streamed per M tile
    cost = pl.CostEstimate(
        flops=4 * M_p * dim_p * hidden_p,
        transcendentals=M_p * hidden_p,
        bytes_accessed=int(M_p * dim_p * (itemsize + out_itemsize)
                           + weight_bytes * weight_reps),
    )

    if single:
        # Weights resident in VMEM: constant block index -> DMA'd once total.
        out2d = pl.pallas_call(
            _ffn_kernel_fused,
            out_shape=jax.ShapeDtypeStruct((M_p, dim_p), out_dtype),
            grid_spec=pltpu.PrefetchScalarGridSpec(
                num_scalar_prefetch=0,
                grid=(n_m,),
                in_specs=[
                    pl.BlockSpec((tile_m, dim_p), lambda i: (i, 0)),    # x rows
                    pl.BlockSpec((dim_p, hidden_p), lambda i: (0, 0)),  # W1 (resident)
                    pl.BlockSpec((1, hidden_p), lambda i: (0, 0)),      # b1
                    pl.BlockSpec((hidden_p, dim_p), lambda i: (0, 0)),  # W2 (resident)
                    pl.BlockSpec((1, dim_p), lambda i: (0, 0)),         # b2
                ],
                out_specs=pl.BlockSpec((tile_m, dim_p), lambda i: (i, 0)),
            ),
            compiler_params=pltpu.CompilerParams(
                dimension_semantics=("parallel",),      # token axis shards across TCs
                vmem_limit_bytes=vmem_limit),
            cost_estimate=cost,
        )(x2d, w1_p, b1_p, w2_p, b2_p)
    else:
        out2d = pl.pallas_call(
            _ffn_kernel_acc,
            out_shape=jax.ShapeDtypeStruct((M_p, dim_p), out_dtype),
            grid_spec=pltpu.PrefetchScalarGridSpec(
                num_scalar_prefetch=0,
                grid=(n_m, n_h),
                in_specs=[
                    pl.BlockSpec((tile_m, dim_p), lambda i, j: (i, 0)),   # x rows
                    pl.BlockSpec((dim_p, tile_h), lambda i, j: (0, j)),   # W1 hidden tile
                    pl.BlockSpec((1, tile_h), lambda i, j: (0, j)),       # b1 hidden tile
                    pl.BlockSpec((tile_h, dim_p), lambda i, j: (j, 0)),   # W2 hidden tile
                    pl.BlockSpec((1, dim_p), lambda i, j: (0, 0)),        # b2
                ],
                out_specs=pl.BlockSpec((tile_m, dim_p), lambda i, j: (i, 0)),
                scratch_shapes=[pltpu.VMEM((tile_m, dim_p), jnp.float32)],
            ),
            compiler_params=pltpu.CompilerParams(
                dimension_semantics=("parallel", "arbitrary"),
                vmem_limit_bytes=vmem_limit),
            cost_estimate=cost,
        )(x2d, w1_p, b1_p, w2_p, b2_p)

    if (M_p, dim_p) != (M, dim):
        out2d = out2d[:M, :dim]
    return out2d.reshape(B, S, dim)


def init_params(key, dim, hidden_dim, dtype=jnp.float32):
    """nn.Linear-style init; weights stored as (in, out) so the kernel does x @ W + b."""
    k1, k2, k3, k4 = jax.random.split(key, 4)
    lim1 = 1.0 / math.sqrt(dim)
    lim2 = 1.0 / math.sqrt(hidden_dim)
    w1 = jax.random.uniform(k1, (dim, hidden_dim), dtype, -lim1, lim1)
    b1 = jax.random.uniform(k2, (1, hidden_dim), dtype, -lim1, lim1)
    w2 = jax.random.uniform(k3, (hidden_dim, dim), dtype, -lim2, lim2)
    b2 = jax.random.uniform(k4, (1, dim), dtype, -lim2, lim2)
    return w1, b1, w2, b2


def _reference(x, w1, b1, w2, b2):
    h = x @ w1 + b1[0]
    h = jax.nn.gelu(h, approximate=False)
    return h @ w2 + b2[0]


if __name__ == "__main__":
    # --- small primary example (module-consistent shapes) ---
    B, S, dim, hidden_dim = 2, 8, 32, 64
    key = jax.random.PRNGKey(0)
    kx, kp = jax.random.split(key)
    x = jax.random.normal(kx, (B, S, dim), jnp.float32)
    w1, b1, w2, b2 = init_params(kp, dim, hidden_dim)

    out = jax.block_until_ready(feed_forward(x, w1, b1, w2, b2))
    ref = _reference(x, w1, b1, w2, b2)
    assert out.shape == (B, S, dim)
    assert jnp.allclose(out, ref, atol=1e-4, rtol=1e-4), "mismatch vs reference (small)"

    # --- forces the hidden-tiled accumulator path (tiny VMEM budget) ---
    B2, S2, dim2, hidden2 = 4, 128, 128, 1024
    kx2, kp2 = jax.random.split(jax.random.PRNGKey(0), 2)
    x2 = jax.random.normal(kx2, (B2, S2, dim2), jnp.float32)
    p2 = init_params(kp2, dim2, hidden2)
    out2 = jax.block_until_ready(feed_forward(x2, *p2, vmem_budget_mib=2))
    ref2 = _reference(x2, *p2)
    assert out2.shape == (B2, S2, dim2)
    assert jnp.allclose(out2, ref2, atol=1e-4, rtol=1e-4), "mismatch vs reference (tiled)"

    # --- optional bf16-compute path (f32 accumulation) ---
    out3 = jax.block_until_ready(
        feed_forward(x, w1, b1, w2, b2, compute_dtype=jnp.bfloat16))
    assert out3.shape == (B, S, dim)
    assert jnp.allclose(out3, ref, atol=5e-2, rtol=5e-2), "mismatch vs reference (bf16)"

    print("KERNEL_OK")
</pallas_src>

<mosaic_0001>
module attributes {stable_mosaic.version = 11 : i64} {
  func.func @_ffn_kernel_fused(%arg0: i32, %arg1: memref<16x128xf32, #tpu.memory_space<vmem>>, %arg2: memref<128x128xf32, #tpu.memory_space<vmem>>, %arg3: memref<1x128xf32, #tpu.memory_space<vmem>>, %arg4: memref<128x128xf32, #tpu.memory_space<vmem>>, %arg5: memref<1x128xf32, #tpu.memory_space<vmem>>, %arg6: memref<16x128xf32, #tpu.memory_space<vmem>>) attributes {dimension_semantics = [#tpu.dimension_semantics<parallel>], iteration_bounds = array<i64: 1>, scalar_prefetch = 0 : i64, scratch_operands = 0 : i64, tpu.core_type = #tpu.core_type<tc>, window_params = [{transform_indices = @transform_0, window_bounds = array<i64: 16, 128>}, {pipeline_mode = #tpu.pipeline_mode<synchronous>, transform_indices = @transform_1, window_bounds = array<i64: 128, 128>}, {pipeline_mode = #tpu.pipeline_mode<synchronous>, transform_indices = @transform_2, window_bounds = array<i64: 1, 128>}, {pipeline_mode = #tpu.pipeline_mode<synchronous>, transform_indices = @transform_3, window_bounds = array<i64: 128, 128>}, {pipeline_mode = #tpu.pipeline_mode<synchronous>, transform_indices = @transform_4, window_bounds = array<i64: 1, 128>}, {transform_indices = @transform_5, window_bounds = array<i64: 16, 128>}]} {
    %c0 = arith.constant 0 : index
    %c0_0 = arith.constant 0 : index
    %0 = vector.load %arg1[%c0, %c0_0] : memref<16x128xf32, #tpu.memory_space<vmem>>, vector<16x128xf32>
    %c0_1 = arith.constant 0 : index
    %c0_2 = arith.constant 0 : index
    %1 = vector.load %arg2[%c0_1, %c0_2] : memref<128x128xf32, #tpu.memory_space<vmem>>, vector<128x128xf32>
    %cst = arith.constant dense<0.000000e+00> : vector<16x128xf32>
    %2 = tpu.matmul %0, %1, %cst {dimension_numbers = #tpu.dot_dimension_numbers<[1], [0], [0], [1], [0, 0, 1, 1], [], []>} : vector<16x128xf32>, vector<128x128xf32>, vector<16x128xf32> -> vector<16x128xf32>
    %c0_3 = arith.constant 0 : index
    %c0_4 = arith.constant 0 : index
    %3 = vector.load %arg3[%c0_3, %c0_4] : memref<1x128xf32, #tpu.memory_space<vmem>>, vector<1x128xf32>
    %4 = vector.broadcast %3 : vector<1x128xf32> to vector<16x128xf32>
    %5 = arith.addf %2, %4 : vector<16x128xf32>
    %cst_5 = arith.constant 5.000000e-01 : f32
    %6 = vector.broadcast %cst_5 : f32 to vector<16x128xf32>
    %7 = arith.mulf %6, %5 : vector<16x128xf32>
    %cst_6 = arith.constant 0.707106769 : f32
    %8 = vector.broadcast %cst_6 : f32 to vector<16x128xf32>
    %9 = arith.mulf %5, %8 : vector<16x128xf32>
    %10 = math.erf %9 : vector<16x128xf32>
    %cst_7 = arith.constant 1.000000e+00 : f32
    %11 = vector.broadcast %cst_7 : f32 to vector<16x128xf32>
    %12 = arith.addf %11, %10 : vector<16x128xf32>
    %13 = arith.mulf %7, %12 : vector<16x128xf32>
    %c0_8 = arith.constant 0 : index
    %c0_9 = arith.constant 0 : index
    %14 = vector.load %arg4[%c0_8, %c0_9] : memref<128x128xf32, #tpu.memory_space<vmem>>, vector<128x128xf32>
    %cst_10 = arith.constant dense<0.000000e+00> : vector<16x128xf32>
    %15 = tpu.matmul %13, %14, %cst_10 {dimension_numbers = #tpu.dot_dimension_numbers<[1], [0], [0], [1], [0, 0, 1, 1], [], []>} : vector<16x128xf32>, vector<128x128xf32>, vector<16x128xf32> -> vector<16x128xf32>
    %c0_11 = arith.constant 0 : index
    %c0_12 = arith.constant 0 : index
    %16 = vector.load %arg5[%c0_11, %c0_12] : memref<1x128xf32, #tpu.memory_space<vmem>>, vector<1x128xf32>
    %17 = vector.broadcast %16 : vector<1x128xf32> to vector<16x128xf32>
    %18 = arith.addf %15, %17 : vector<16x128xf32>
    %c0_13 = arith.constant 0 : index
    %c0_14 = arith.constant 0 : index
    %19 = vector.load %arg6[%c0_13, %c0_14] : memref<16x128xf32, #tpu.memory_space<vmem>>, vector<16x128xf32>
    tpu.vector_store %arg6[%c0_13, %c0_14], %18 {strides = array<i32>} : memref<16x128xf32, #tpu.memory_space<vmem>>, vector<16x128xf32>,
    return
  }
  func.func @transform_0(%arg0: i32) -> (i32, i32) {
    %c0_i32 = arith.constant 0 : i32
    %c0_i32_0 = arith.constant 0 : i32
    return %arg0, %c0_i32 : i32, i32
  }
  func.func @transform_1(%arg0: i32) -> (i32, i32) {
    %c0_i32 = arith.constant 0 : i32
    %c0_i32_0 = arith.constant 0 : i32
    %c0_i32_1 = arith.constant 0 : i32
    return %c0_i32, %c0_i32_0 : i32, i32
  }
  func.func @transform_2(%arg0: i32) -> (i32, i32) {
    %c0_i32 = arith.constant 0 : i32
    %c0_i32_0 = arith.constant 0 : i32
    %c0_i32_1 = arith.constant 0 : i32
    return %c0_i32, %c0_i32_0 : i32, i32
  }
  func.func @transform_3(%arg0: i32) -> (i32, i32) {
    %c0_i32 = arith.constant 0 : i32
    %c0_i32_0 = arith.constant 0 : i32
    %c0_i32_1 = arith.constant 0 : i32
    return %c0_i32, %c0_i32_0 : i32, i32
  }
  func.func @transform_4(%arg0: i32) -> (i32, i32) {
    %c0_i32 = arith.constant 0 : i32
    %c0_i32_0 = arith.constant 0 : i32
    %c0_i32_1 = arith.constant 0 : i32
    return %c0_i32, %c0_i32_0 : i32, i32
  }
  func.func @transform_5(%arg0: i32) -> (i32, i32) {
    %c0_i32 = arith.constant 0 : i32
    %c0_i32_0 = arith.constant 0 : i32
    return %arg0, %c0_i32 : i32, i32
  }
}

</mosaic_0001>

<bundles_post_ra>
// kernel: feed_forward.1
= control target key start
LH: loop header
LB: loop body
LE: loop exit
PB: predicated region body
PF: predicated region fallthrough
CT: control target
= control target key end

     0   :  { %s416_s1 = inlined_call_operand.vmem [shape: f32[128,128], index: 1, kind: input, shape index: {}]   ;;  %s417_s2 = inlined_call_operand.vmem [shape: f32[1,128], index: 2, kind: input, shape index: {}]   ;;  %s418_s0 = inlined_call_operand.vmem [shape: f32[16,128], index: 0, kind: input, shape index: {}]   ;;  %s419_s4 = inlined_call_operand.vmem [shape: f32[1,128], index: 4, kind: input, shape index: {}]   ;;  %s420_s3 = inlined_call_operand.vmem [shape: f32[128,128], index: 3, kind: input, shape index: {}]   ;;  %s421_s5 = inlined_call_operand.vmem [shape: f32[16,128], index: 5, kind: output, shape index: {}]  }
   0x1   :  { %v37_v0 = vld [vmem:[%s416_s1 + $0x78] sm:$0xff]  ;;  %v36_v1 = vld [vmem:[%s416_s1 + $0x70] sm:$0xff]  ;;  %v35_v2 = vld [vmem:[%s416_s1 + $0x68] sm:$0xff] }
   0x2   :  { %42 = vmatpush.msra.mxu0 %v37_v0  ;;  %204 = vmatpush.msra.mxu2 %v37_v0  ;;  %v34_v3 = vld [vmem:[%s416_s1 + $0x60] sm:$0xff]  ;;  %v33_v4 = vld [vmem:[%s416_s1 + $0x58] sm:$0xff]  ;;  %v32_v5 = vld [vmem:[%s416_s1 + $0x50] sm:$0xff] }
   0x3   :  { %v31_v6 = vld [vmem:[%s416_s1 + $0x48] sm:$0xff]  ;;  %v30_v7 = vld [vmem:[%s416_s1 + $0x40] sm:$0xff]  ;;  %v29_v8 = vld [vmem:[%s416_s1 + $0x38] sm:$0xff] }
   0x4   :  { %43 = vmatpush.msra.mxu0 %v36_v1  ;;  %205 = vmatpush.msra.mxu2 %v36_v1  ;;  %v28_v9 = vld [vmem:[%s416_s1 + $0x30] sm:$0xff]  ;;  %v27_v10 = vld [vmem:[%s416_s1 + $0x28] sm:$0xff]  ;;  %v26_v11 = vld [vmem:[%s416_s1 + $0x20] sm:$0xff] }
   0x5   :  { %v25_v12 = vld [vmem:[%s416_s1 + $0x18] sm:$0xff]  ;;  %v24_v13 = vld [vmem:[%s416_s1 + $0x10] sm:$0xff]  ;;  %v23_v14 = vld [vmem:[%s416_s1 + $0x8] sm:$0xff] }
   0x6   :  { %44 = vmatpush.msra.mxu0 %v35_v2  ;;  %206 = vmatpush.msra.mxu2 %v35_v2  ;;  %v22_v15 = vld [vmem:[%s416_s1] sm:$0xff]  ;;  %v21_v17 = vld [vmem:[%s418_s0 + $0x8] sm:$0xff]  ;;  %v168_v18 = vld [vmem:[%s420_s3 + $0x78] sm:$0xff] }
   0x7   :  { %v20_v16 = vld [vmem:[%s418_s0] sm:$0xff]  ;;  %173 = vmatpush.msra.mxu1 %v168_v18  ;;  %220 = vmatpush.msra.mxu3 %v168_v18  ;;  %v167_v19 = vld [vmem:[%s420_s3 + $0x70] sm:$0xff]  ;;  %v166_v20 = vld [vmem:[%s420_s3 + $0x68] sm:$0xff] }
   0x8   :  { %45 = vmatpush.msra.mxu0 %v34_v3  ;;  %207 = vmatpush.msra.mxu2 %v34_v3  ;;  %v165_v21 = vld [vmem:[%s420_s3 + $0x60] sm:$0xff]  ;;  %v164_v23 = vld [vmem:[%s420_s3 + $0x58] sm:$0xff]  ;;  %v163_v25 = vld [vmem:[%s420_s3 + $0x50] sm:$0xff] }
   0x9   :  { %174 = vmatpush.msra.mxu1 %v167_v19  ;;  %221 = vmatpush.msra.mxu3 %v167_v19  ;;  %v236_v22 = vld [vmem:[%s417_s2] ss:$0 sm:$0xff]  ;;  %v162_v27 = vld [vmem:[%s420_s3 + $0x48] sm:$0xff]  ;;  %v160_v30 = vld [vmem:[%s420_s3 + $0x38] sm:$0xff] }
   0xa   :  { %46 = vmatpush.msra.mxu0 %v33_v4  ;;  %208 = vmatpush.msra.mxu2 %v33_v4  ;;  %v161_v29 = vld [vmem:[%s420_s3 + $0x40] sm:$0xff]  ;;  %v159_v33 = vld [vmem:[%s420_s3 + $0x30] sm:$0xff]  ;;  %v158_v36 = vld [vmem:[%s420_s3 + $0x28] sm:$0xff] }
   0xb   :  { %175 = vmatpush.msra.mxu1 %v166_v20  ;;  %222 = vmatpush.msra.mxu3 %v166_v20  ;;  %v157_v39 = vld [vmem:[%s420_s3 + $0x20] sm:$0xff]  ;;  %v156_v43 = vld [vmem:[%s420_s3 + $0x18] sm:$0xff]  ;;  %v155_v47 = vld [vmem:[%s420_s3 + $0x10] sm:$0xff] }
   0xc   :  { %47 = vmatpush.msra.mxu0 %v32_v5  ;;  %209 = vmatpush.msra.mxu2 %v32_v5  ;;  %v154_v52 = vld [vmem:[%s420_s3 + $0x8] sm:$0xff]  ;;  %v153_v56 = vld [vmem:[%s420_s3] sm:$0xff] }
   0xd   :  { %176 = vmatpush.msra.mxu1 %v165_v21  ;;  %223 = vmatpush.msra.mxu3 %v165_v21 }
   0xe   :  { %48 = vmatpush.msra.mxu0 %v31_v6  ;;  %210 = vmatpush.msra.mxu2 %v31_v6 }
   0xf   :  { %177 = vmatpush.msra.mxu1 %v164_v23  ;;  %224 = vmatpush.msra.mxu3 %v164_v23 }
  0x10   :  { %49 = vmatpush.msra.mxu0 %v30_v7  ;;  %211 = vmatpush.msra.mxu2 %v30_v7 }
  0x11   :  { %178 = vmatpush.msra.mxu1 %v163_v25  ;;  %225 = vmatpush.msra.mxu3 %v163_v25 }
  0x12   :  { %50 = vmatpush.msra.mxu0 %v29_v8  ;;  %212 = vmatpush.msra.mxu2 %v29_v8 }
  0x13   :  { %179 = vmatpush.msra.mxu1 %v162_v27  ;;  %226 = vmatpush.msra.mxu3 %v162_v27 }
  0x14   :  { %51 = vmatpush.msra.mxu0 %v28_v9  ;;  %213 = vmatpush.msra.mxu2 %v28_v9 }
  0x15   :  { %180 = vmatpush.msra.mxu1 %v161_v29  ;;  %227 = vmatpush.msra.mxu3 %v161_v29 }
  0x16   :  { %52 = vmatpush.msra.mxu0 %v27_v10  ;;  %214 = vmatpush.msra.mxu2 %v27_v10 }
  0x17   :  { %181 = vmatpush.msra.mxu1 %v160_v30  ;;  %228 = vmatpush.msra.mxu3 %v160_v30 }
  0x18   :  { %53 = vmatpush.msra.mxu0 %v26_v11  ;;  %215 = vmatpush.msra.mxu2 %v26_v11 }
  0x19   :  { %182 = vmatpush.msra.mxu1 %v159_v33  ;;  %229 = vmatpush.msra.mxu3 %v159_v33 }
  0x1a   :  { %54 = vmatpush.msra.mxu0 %v25_v12  ;;  %216 = vmatpush.msra.mxu2 %v25_v12 }
  0x1b   :  { %183 = vmatpush.msra.mxu1 %v158_v36  ;;  %230 = vmatpush.msra.mxu3 %v158_v36 }
  0x1c   :  { %55 = vmatpush.msra.mxu0 %v24_v13  ;;  %217 = vmatpush.msra.mxu2 %v24_v13 }
  0x1d   :  { %184 = vmatpush.msra.mxu1 %v157_v39  ;;  %231 = vmatpush.msra.mxu3 %v157_v39 }
  0x1e   :  { %56 = vmatpush.msra.mxu0 %v23_v14  ;;  %218 = vmatpush.msra.mxu2 %v23_v14 }
  0x1f   :  { %185 = vmatpush.msra.mxu1 %v156_v43  ;;  %232 = vmatpush.msra.mxu3 %v156_v43 }
  0x20   :  { %57 = vmatpush.msra.mxu0 %v22_v15  ;;  %219 = vmatpush.msra.mxu2 %v22_v15 }
  0x21   :  { %58 = vmatmul.f32.vlgmr.msra.gmra.mxu0 %v20_v16  ;;  %61 = vmatmul.f32.vlgmr.msra.gmra.mxu2 %v21_v17 }
  0x22   :  { %186 = vmatpush.msra.mxu1 %v155_v47  ;;  %233 = vmatpush.msra.mxu3 %v155_v47 }
  0x24   :  { %187 = vmatpush.msra.mxu1 %v154_v52  ;;  %234 = vmatpush.msra.mxu3 %v154_v52 }
  0x26   :  { %188 = vmatpush.msra.mxu1 %v153_v56  ;;  %235 = vmatpush.msra.mxu3 %v153_v56  ;;  %v237_v56 = vld [vmem:[%s419_s4] ss:$0 sm:$0xff] }
  0x9e   :  { %v59_v24 = vpop.f32.mrf.mxu0 }
  0x9f   :  { %v347_v26 = vadd.f32 %v236_v22, %v59_v24 }
  0xa1   :  { %v353_v28 = vmul.f32 0.70710677, %v347_v26  ;;  %v65_v47 = vmul.f32 0.5, %v347_v26 }
  0xa3   :  { %v69_v31 = vmul.f32 %v353_v28, %v353_v28 }
  0xa4   :  { %v62_v32 = vpop.f32.mrf.mxu2 }
  0xa5   :  { %v366_v34 = vmin.f32 %v69_v31, 16.0  ;;  %v368_v35 = vadd.f32 %v236_v22, %v62_v32 }
  0xa7   :  { %v71_v37 = vmul.f32 2.1237322e-06, %v366_v34  ;;  %v375_v38 = vmul.f32 0.70710677, %v368_v35  ;;  %v82_v40 = vmul.f32 3.8918573e-05, %v366_v34 }
  0xa9   :  { %v72_v41 = vadd.f32 0.00028619796, %v71_v37  ;;  %v109_v42 = vmul.f32 %v375_v38, %v375_v38  ;;  %v83_v44 = vadd.f32 0.001143296, %v82_v40 }
  0xab   :  { %v73_v45 = vmul.f32 %v72_v41, %v366_v34  ;;  %v110_v46 = vmin.f32 %v109_v42, 16.0  ;;  %v84_v48 = vmul.f32 %v83_v44, %v366_v34 }
  0xad   :  { %v111_v49 = vmul.f32 2.1237322e-06, %v110_v46  ;;  %v122_v50 = vmul.f32 3.8918573e-05, %v110_v46  ;;  %v74_v51 = vadd.f32 0.0036580483, %v73_v45 }
  0xae   :  { %v85_v53 = vadd.f32 0.014752088, %v84_v48 }
  0xaf   :  { %v112_v54 = vadd.f32 0.00028619796, %v111_v49  ;;  %v123_v55 = vadd.f32 0.001143296, %v122_v50  ;;  %v75_v60 = vmul.f32 %v74_v51, %v366_v34 }
  0xb0   :  { %v86_v57 = vmul.f32 %v85_v53, %v366_v34  ;;  %v66_v53 = vmul.f32 0.5, %v368_v35 }
  0xb1   :  { %v113_v58 = vmul.f32 %v112_v54, %v110_v46  ;;  %v124_v59 = vmul.f32 %v123_v55, %v110_v46  ;;  %v76_v2 = vadd.f32 0.05243302, %v75_v60 }
  0xb2   :  { %v87_v61 = vadd.f32 0.112945676, %v86_v57 }
  0xb3   :  { %v114_v62 = vadd.f32 0.0036580483, %v113_v58  ;;  %v125_v63 = vadd.f32 0.014752088, %v124_v59  ;;  %v77_v8 = vmul.f32 %v76_v2, %v366_v34 }
  0xb4   :  { %v88_v0 = vmul.f32 %v87_v61, %v366_v34 }
  0xb5   :  { %v126_v1 = vmul.f32 %v125_v63, %v110_v46  ;;  %v115_v4 = vmul.f32 %v114_v62, %v110_v46  ;;  %v78_v13 = vadd.f32 0.18741608, %v77_v8 }
  0xb6   :  { %v89_v3 = vadd.f32 0.4994258, %v88_v0 }
  0xb7   :  { %v127_v5 = vadd.f32 0.112945676, %v126_v1  ;;  %v116_v10 = vadd.f32 0.05243302, %v115_v4  ;;  %v79_v17 = vmul.f32 %v78_v13, %v366_v34 }
  0xb8   :  { %v90_v6 = vmul.f32 %v89_v3, %v366_v34 }
  0xb9   :  { %v128_v7 = vmul.f32 %v127_v5, %v110_v46  ;;  %v117_v14 = vmul.f32 %v116_v10, %v110_v46  ;;  %v80_v21 = vadd.f32 1.1283791, %v79_v17 }
  0xba   :  { %v91_v9 = vadd.f32 1.0, %v90_v6 }
  0xbb   :  { %v129_v11 = vadd.f32 0.4994258, %v128_v7  ;;  %v118_v18 = vadd.f32 0.18741608, %v117_v14  ;;  %v81_v31 = vmul.f32 %v80_v21, %v353_v28 }
  0xbc   :  { %238 = vrcp.f32 %v91_v9  ;;  %v103_v22 = vand.u32 2147483648, %v91_v9  ;;  %v101_v27 = vand.u32 2147483647, %v91_v9  ;;  %vm97_vm1 = vweird.f32 %v91_v9 }
  0xbd   :  { %v130_v12 = vmul.f32 %v129_v11, %v110_v46  ;;  %v119_v24 = vmul.f32 %v118_v18, %v110_v46 }
  0xbe   :  { %v104_v32 = vor.u32 1.1754944e-38, %v103_v22  ;;  %vm102_vm3 = vcmp.eq.f32.partialorder %v101_v27, 8.507059e+37 }
  0xbf   :  { %v131_v15 = vadd.f32 1.0, %v130_v12  ;;  %v120_v36 = vadd.f32 1.1283791, %v119_v24 }
  0xc1   :  { %240 = vrcp.f32 %v131_v15  ;;  %v143_v37 = vand.u32 2147483648, %v131_v15  ;;  %v141_v41 = vand.u32 2147483647, %v131_v15  ;;  %vm137_vm5 = vweird.f32 %v131_v15 }
  0xc2   :  { %v239_v16 = vpop.eup %238  ;;  %v121_v46 = vmul.f32 %v120_v36, %v375_v38 }
  0xc3   :  { %v93_v19 = vmul.f32 %v239_v16, %v91_v9  ;;  %vm98_vm0 = vweird.f32 %v239_v16  ;;  %v144_v45 = vor.u32 1.1754944e-38, %v143_v37  ;;  %vm142_vm7 = vcmp.eq.f32.partialorder %v141_v41, 8.507059e+37 }
  0xc4   :  { %vm99_vm2 = vmor %vm97_vm1, %vm98_vm0 }
  0xc5   :  { %v94_v20 = vsub.f32 1.0, %v93_v19 }
  0xc7   :  { %v241_v23 = vpop.eup %240  ;;  %v95_v25 = vmul.f32 %v239_v16, %v94_v20 }
  0xc8   :  { %v133_v29 = vmul.f32 %v241_v23, %v131_v15  ;;  %vm138_vm4 = vweird.f32 %v241_v23 }
  0xc9   :  { %v96_v30 = vadd.f32 %v239_v16, %v95_v25  ;;  %vm139_vm6 = vmor %vm137_vm5, %vm138_vm4 }
  0xca   :  { %v134_v33 = vsub.f32 1.0, %v133_v29 }
  0xcb   :  { %v100_v34 = vsel %vm99_vm2, %v239_v16, %v96_v30 }
  0xcc   :  { %v105_v39 = vsel %vm102_vm3, %v104_v32, %v100_v34  ;;  %v135_v40 = vmul.f32 %v241_v23, %v134_v33 }
  0xcd   :  { %v106_v42 = vmul.f32 %v105_v39, %v81_v31 }
  0xce   :  { %v136_v43 = vadd.f32 %v241_v23, %v135_v40 }
  0xcf   :  { %v202_v44 = vclamps-f32 %v106_v42, 1.0 }
  0xd0   :  { %v140_v28 = vsel %vm139_vm6, %v241_v23, %v136_v43 }
  0xd1   :  { %v149_v48 = vadd.f32 1.0, %v202_v44  ;;  %v145_v49 = vsel %vm142_vm7, %v144_v45, %v140_v28 }
  0xd2   :  { %v146_v50 = vmul.f32 %v145_v49, %v121_v46 }
  0xd3   :  { %v151_v51 = vmul.f32 %v149_v48, %v65_v47 }
  0xd4   :  { %v203_v52 = vclamps-f32 %v146_v50, 1.0 }
  0xd5   :  { %189 = vmatmul.f32.vlgmr.msra.gmra.mxu1 %v151_v51 }
  0xd6   :  { %v150_v54 = vadd.f32 1.0, %v203_v52 }
  0xd8   :  { %v152_v55 = vmul.f32 %v150_v54, %v66_v53 }
  0xda   :  { %192 = vmatmul.f32.vlgmr.msra.gmra.mxu3 %v152_v55 }
 0x152   :  { %v190_v38 = vpop.f32.mrf.mxu1 }
 0x153   :  { %v191_v57 = vadd.f32 %v237_v56, %v190_v38 }
 0x155   :  { %196 = vst [vmem:[%s421_s5] sm:$0xff] %v191_v57 }
 0x15d   :  { %v193_v26 = vpop.f32.mrf.mxu3 }
 0x15e   :  { %v194_v58 = vadd.f32 %v237_v56, %v193_v26 }
 0x160   :  { %197 = vst [vmem:[%s421_s5 + $0x8] sm:$0xff] %v194_v58 }

</bundles_post_ra>
